<compile_context>
chip_gen: v6e
topology: v6e:2x2x1
jax: 0.10.0
libtpu: 0.0.40
codegen_flags: <defaults>
</compile_context>

<pallas_src>
import functools

import jax
import jax.numpy as jnp
import numpy as np
from jax.experimental import pallas as pl
from jax.experimental.pallas import tpu as pltpu


def _round_up(v: int, m: int) -> int:
    return ((v + m - 1) // m) * m


def _pool_matrix_np(in_size: int, out_size: int) -> np.ndarray:
    """Exact adaptive-avg-pool weighting matrix (out_size, in_size), f32, host-side.

    Integer bin boundaries (matches PyTorch):
      start = (i * in) // out,  end = ceil((i + 1) * in / out)
    """
    i = np.arange(out_size, dtype=np.int64)
    start = (i * in_size) // out_size
    end = ((i + 1) * in_size + out_size - 1) // out_size
    idx = np.arange(in_size, dtype=np.int64)
    mask = (idx[None, :] >= start[:, None]) & (idx[None, :] < end[:, None])
    counts = (end - start).astype(np.float32)
    return mask.astype(np.float32) / counts[:, None]


def _adaptive_avg_pool_kernel(x_ref, pt_ref, o_ref):
    # x_ref:  (TB, HWp)   batch tile, lane-dense, native dtype (no up-cast)
    # pt_ref: (HWp, OHW)  pooling matrix kron(Ph, Pw)^T, resident in VMEM
    # o_ref:  (TB, OHW)
    o_ref[...] = jnp.dot(
        x_ref[...], pt_ref[...], preferred_element_type=jnp.float32
    ).astype(o_ref.dtype)


def _vmem_plan():
    """Generation-aware (vmem_limit_bytes, target_input_tile_bytes)."""
    try:
        phys = int(pltpu.get_tpu_info().vmem_capacity_bytes)
    except Exception:
        phys = 64 * 1024 * 1024  # conservative fallback = v7x physical VMEM
    if phys >= 96 * 1024 * 1024:               # v5e / v6e: 128 MiB physical
        return 64 * 1024 * 1024, 16 * 1024 * 1024
    return 40 * 1024 * 1024, 8 * 1024 * 1024   # v7x: 64 MiB physical


@functools.partial(jax.jit, static_argnums=(1,))
def avg_pool2d(x: jnp.ndarray, output_size) -> jnp.ndarray:
    """Equivalent of AvgPool2d.forward: adaptive avg pool then flatten to (N, -1)."""
    if isinstance(output_size, int):
        oh, ow = output_size, output_size
    else:
        oh, ow = output_size

    if not jnp.issubdtype(x.dtype, jnp.floating):
        x = x.astype(jnp.float32)

    n, c, h, w = x.shape
    b = n * c
    hw = h * w
    ohw = oh * ow

    # ---- pooling matrix (host numpy; constant-folded under jit) -------------
    # kron(Ph, Pw) ordering matches the row-major (H, W) flatten.
    pt_np = np.kron(_pool_matrix_np(h, oh), _pool_matrix_np(w, ow)).T  # (HW, OHW)

    in_itemsize = jnp.dtype(x.dtype).itemsize
    pt_dtype = x.dtype if in_itemsize < 4 else jnp.float32  # bf16 in -> bf16 weights, f32 acc

    # Lane-pad the contraction dim to a multiple of 128: full-width unmasked
    # loads and an aligned MXU K dim.  Zeros contribute nothing to the sums.
    hw_pad = _round_up(hw, 128)
    if hw_pad != hw:
        pt_np = np.pad(pt_np, ((0, hw_pad - hw), (0, 0)))
    pt = jnp.asarray(pt_np, dtype=pt_dtype)

    xr = x.reshape(b, hw)
    if hw_pad != hw:
        xr = jnp.pad(xr, ((0, 0), (0, hw_pad - hw)))

    # ---- batch tiling: generation-aware, VMEM-budgeted, balanced, >=2 steps --
    vmem_limit, target_tile_bytes = _vmem_plan()

    pt_itemsize = jnp.dtype(pt_dtype).itemsize
    ohw_lane = _round_up(ohw, 128)                 # VMEM lane padding of narrow dims
    in_row_bytes = hw_pad * in_itemsize
    out_row_vmem = ohw_lane * in_itemsize
    pt_vmem = hw_pad * ohw_lane * pt_itemsize

    headroom = 2 * 1024 * 1024
    block_budget = vmem_limit - 2 * pt_vmem - headroom
    if block_budget <= 2 * (in_row_bytes + out_row_vmem) * 8:
        # TODO(synk): for ImageNet-scale H*W the resident kron(Ph,Pw) matrix no longer
        # fits in VMEM; factor the pool into two matmuls (x @ Pw^T then Ph @ .) so the
        # resident weights shrink to H*OH + W*OW.
        cand_budget = 8
    else:
        cand_budget = block_budget // (2 * (in_row_bytes + out_row_vmem))
    cand_target = max(8, target_tile_bytes // in_row_bytes)
    cand = max(8, (min(cand_budget, cand_target) // 8) * 8)

    num_steps = max(1, -(-b // cand))
    if b >= 16:
        num_steps = max(num_steps, 2)      # keep v7x's second TensorCore busy
    if num_steps == 1:
        tb = b                             # full-batch block is always legal
    else:
        tb = _round_up(-(-b // num_steps), 8)  # balanced tiles, multiple of 8

    grid = (pl.cdiv(b, tb),)

    cost = pl.CostEstimate(
        flops=2 * b * hw_pad * ohw,
        transcendentals=0,
        bytes_accessed=b * hw_pad * in_itemsize
        + b * ohw * in_itemsize
        + hw_pad * ohw * pt_itemsize,
    )

    out = pl.pallas_call(
        _adaptive_avg_pool_kernel,
        out_shape=jax.ShapeDtypeStruct((b, ohw), x.dtype),
        grid=grid,
        in_specs=[
            pl.BlockSpec((tb, hw_pad), lambda i: (i, 0)),   # tiled batch (double-buffered)
            # Constant index_map -> DMA'd once, stays resident across grid steps.
            # (pl.Buffered(1) would halve its VMEM reservation, but it is tiny here and
            #  skipping it keeps compatibility across jax versions.)
            pl.BlockSpec((hw_pad, ohw), lambda i: (0, 0)),
        ],
        out_specs=pl.BlockSpec((tb, ohw), lambda i: (i, 0)),
        compiler_params=pltpu.CompilerParams(
            dimension_semantics=("parallel",),   # shard batch grid across v7x's 2 TCs
            vmem_limit_bytes=vmem_limit,
        ),
        cost_estimate=cost,
    )(xr, pt)

    # x.view(x.size(0), -1): (N*C, OH*OW) -> (N, C*OH*OW) is a contiguous reshape.
    return out.reshape(n, c * ohw)


def _reference_adaptive_avg_pool(x, oh, ow):
    """Direct (loop) reference for adaptive avg pool, flattened to (N, -1)."""
    n, c, h, w = x.shape
    out = jnp.zeros((n, c, oh, ow), dtype=jnp.float32)
    for i in range(oh):
        hs = (i * h) // oh
        he = ((i + 1) * h + oh - 1) // oh
        for j in range(ow):
            ws = (j * w) // ow
            we = ((j + 1) * w + ow - 1) // ow
            out = out.at[:, :, i, j].set(
                x[:, :, hs:he, ws:we].astype(jnp.float32).mean(axis=(2, 3))
            )
    return out.reshape(n, -1)


if __name__ == "__main__":
    key = jax.random.PRNGKey(0)

    # Test 1: spec shapes, evenly divisible windows.
    N, C, H, W = 2, 4, 16, 16
    OUTPUT_SIZE = 4
    x = jax.random.normal(key, (N, C, H, W), dtype=jnp.float32)
    y = jax.block_until_ready(avg_pool2d(x, OUTPUT_SIZE))
    kh, kw = H // OUTPUT_SIZE, W // OUTPUT_SIZE
    ref = x.reshape(N, C, OUTPUT_SIZE, kh, OUTPUT_SIZE, kw).mean(axis=(3, 5)).reshape(N, -1)
    assert y.shape == (N, C * OUTPUT_SIZE * OUTPUT_SIZE), y.shape
    assert jnp.allclose(y, ref, atol=1e-5, rtol=1e-5)

    # Test 2: uneven adaptive bins + rectangular output + H*W not a multiple of 128.
    k2 = jax.random.fold_in(key, 1)
    x2 = jax.random.normal(k2, (2, 3, 10, 7), dtype=jnp.float32)
    y2 = jax.block_until_ready(avg_pool2d(x2, (3, 5)))
    ref2 = _reference_adaptive_avg_pool(x2, 3, 5)
    assert y2.shape == ref2.shape, (y2.shape, ref2.shape)
    assert jnp.allclose(y2, ref2, atol=1e-5, rtol=1e-5)

    # Test 3: large batch -> balanced multi-step (>=2) pipelined grid.
    k3 = jax.random.fold_in(key, 2)
    x3 = jax.random.normal(k3, (3, 1024, 16, 16), dtype=jnp.float32)  # B = 3072
    y3 = jax.block_until_ready(avg_pool2d(x3, 2))
    ref3 = x3.reshape(3, 1024, 2, 8, 2, 8).mean(axis=(3, 5)).reshape(3, -1)
    assert jnp.allclose(y3, ref3, atol=1e-5, rtol=1e-5)

    # Test 4: bf16 input stays in native dtype end-to-end (no in-kernel up-cast).
    k4 = jax.random.fold_in(key, 3)
    x4 = jax.random.normal(k4, (2, 8, 16, 16), dtype=jnp.bfloat16)
    y4 = jax.block_until_ready(avg_pool2d(x4, 4))
    ref4 = (
        x4.astype(jnp.float32)
        .reshape(2, 8, 4, 4, 4, 4)
        .mean(axis=(3, 5))
        .reshape(2, -1)
    )
    assert y4.dtype == jnp.bfloat16
    assert jnp.allclose(y4.astype(jnp.float32), ref4, atol=2e-2, rtol=2e-2)

    print("KERNEL_OK")
</pallas_src>

<mosaic_0001>
module attributes {stable_mosaic.version = 11 : i64} {
  func.func @_adaptive_avg_pool_kernel(%arg0: i32, %arg1: memref<8x256xf32, #tpu.memory_space<vmem>>, %arg2: memref<256x16xf32, #tpu.memory_space<vmem>>, %arg3: memref<8x16xf32, #tpu.memory_space<vmem>>) attributes {dimension_semantics = [#tpu.dimension_semantics<parallel>], iteration_bounds = array<i64: 1>, scalar_prefetch = 0 : i64, scratch_operands = 0 : i64, tpu.core_type = #tpu.core_type<tc>, window_params = [{transform_indices = @transform_0, window_bounds = array<i64: 8, 256>}, {pipeline_mode = #tpu.pipeline_mode<synchronous>, transform_indices = @transform_1, window_bounds = array<i64: 256, 16>}, {transform_indices = @transform_2, window_bounds = array<i64: 8, 16>}]} {
    %c0 = arith.constant 0 : index
    %c0_0 = arith.constant 0 : index
    %0 = vector.load %arg1[%c0, %c0_0] : memref<8x256xf32, #tpu.memory_space<vmem>>, vector<8x256xf32>
    %c0_1 = arith.constant 0 : index
    %c0_2 = arith.constant 0 : index
    %1 = vector.load %arg2[%c0_1, %c0_2] : memref<256x16xf32, #tpu.memory_space<vmem>>, vector<256x16xf32>
    %cst = arith.constant dense<0.000000e+00> : vector<8x16xf32>
    %2 = tpu.matmul %0, %1, %cst {dimension_numbers = #tpu.dot_dimension_numbers<[1], [0], [0], [1], [0, 0, 1, 1], [], []>} : vector<8x256xf32>, vector<256x16xf32>, vector<8x16xf32> -> vector<8x16xf32>
    %c0_3 = arith.constant 0 : index
    %c0_4 = arith.constant 0 : index
    %3 = vector.load %arg3[%c0_3, %c0_4] : memref<8x16xf32, #tpu.memory_space<vmem>>, vector<8x16xf32>
    tpu.vector_store %arg3[%c0_3, %c0_4], %2 {strides = array<i32>} : memref<8x16xf32, #tpu.memory_space<vmem>>, vector<8x16xf32>,
    return
  }
  func.func @transform_0(%arg0: i32) -> (i32, i32) {
    %c0_i32 = arith.constant 0 : i32
    %c0_i32_0 = arith.constant 0 : i32
    return %arg0, %c0_i32 : i32, i32
  }
  func.func @transform_1(%arg0: i32) -> (i32, i32) {
    %c0_i32 = arith.constant 0 : i32
    %c0_i32_0 = arith.constant 0 : i32
    %c0_i32_1 = arith.constant 0 : i32
    return %c0_i32, %c0_i32_0 : i32, i32
  }
  func.func @transform_2(%arg0: i32) -> (i32, i32) {
    %c0_i32 = arith.constant 0 : i32
    %c0_i32_0 = arith.constant 0 : i32
    return %arg0, %c0_i32 : i32, i32
  }
}

</mosaic_0001>

<bundles_post_ra>
// kernel: avg_pool2d.1
= control target key start
LH: loop header
LB: loop body
LE: loop exit
PB: predicated region body
PF: predicated region fallthrough
CT: control target
= control target key end

     0   :  { %7 = vsyncpa [#allocation3], 0  ;;  %s196_s9 = smov [#allocation2]   ;;  %s226_s0 = inlined_call_operand.vmem [shape: f32[8,256], index: 0, kind: input, shape index: {}]   ;;  %s227_s1 = inlined_call_operand.hbm [shape: f32[256,16], index: 1, kind: input, shape index: {}]   ;;  %s228_s2 = inlined_call_operand.vmem [shape: f32[8,16], index: 2, kind: output, shape index: {}]  }
   0x1   :  { %s15_s10 = sshll.u32 %s196_s9, 4  ;;  %s16_s10 = int_to_ptr.vmem [resolvable:$true] %s15_s10 }
   0x2   :  { %s182_s11 = scalar_lea.vmem %s16_s10, 4096  ;;  %p187_p1 = scmp.lt.s32.totalorder %s16_s10, %s16_s10 }
   0x3   :  { %p183_p0 = scmp.ne.s32.totalorder %s16_s10, %s182_s11  ;;  %p188_p2 = scmp.lt.s32.totalorder %s182_s11, %s182_s11 }
   0x5   :  { %p189_p3 = por %p188_p2, %p187_p1 }
   0x7   :  { %p190_p4 = pnand %p189_p3, %p183_p0 }
   0x9   :  { %193 = shalt.err (!%p190_p4)
}
   0xa   :  { %s197_s12 = smov 128   ;;  %s198_s13 = smov 8  }
   0xb   :  { %21 = dma.hbm_to_vmem [thread:$0]  %s227_s1, 4096, %s16_s10, [#allocation3], %s197_s12, %s197_s12, %s198_s13  }
   0xc   :  { %194 = dma.done.wait [#allocation3], 4096  }
   0xd   :  { %195 = vsyncadd [#allocation3], 4294963200  ;;  %v58_v0 = vld [vmem:[#allocation2 + $0xf8] sm:$0xff]  ;;  %v57_v2 = vld [vmem:[#allocation2 + $0xf0] sm:$0xff]  ;;  %vm129_vm0 = vcmask 130048  }
   0xe   :  { %v42_v1 = vld [vmem:[#allocation2 + $0x78] sm:$0xff]  ;;  %136 = vmatprep.subr.mxu0 %v58_v0  ;;  %v41_v3 = vld [vmem:[#allocation2 + $0x70] sm:$0xff]  ;;  %v56_v4 = vld [vmem:[#allocation2 + $0xe8] sm:$0xff] }
   0xf   :  { %137 = vmatpush3.msra.mxu0 %v42_v1  ;;  %v40_v5 = vld [vmem:[#allocation2 + $0x68] sm:$0xff]  ;;  %v55_v6 = vld [vmem:[#allocation2 + $0xe0] sm:$0xff]  ;;  %v54_v8 = vld [vmem:[#allocation2 + $0xd8] sm:$0xff] }
  0x10   :  { %138 = vmatprep.subr.mxu0 %v57_v2  ;;  %v39_v7 = vld [vmem:[#allocation2 + $0x60] sm:$0xff]  ;;  %v38_v9 = vld [vmem:[#allocation2 + $0x58] sm:$0xff]  ;;  %v53_v10 = vld [vmem:[#allocation2 + $0xd0] sm:$0xff] }
  0x11   :  { %139 = vmatpush3.msra.mxu0 %v41_v3  ;;  %v37_v11 = vld [vmem:[#allocation2 + $0x50] sm:$0xff]  ;;  %v52_v12 = vld [vmem:[#allocation2 + $0xc8] sm:$0xff]  ;;  %v51_v15 = vld [vmem:[#allocation2 + $0xc0] sm:$0xff] }
  0x12   :  { %140 = vmatprep.subr.mxu0 %v56_v4  ;;  %v26_v13 = vld [vmem:[%s226_s0 + $0x8] sm:$0xff]  ;;  %v35_v16 = vld [vmem:[#allocation2 + $0x40] sm:$0xff]  ;;  %v50_v17 = vld [vmem:[#allocation2 + $0xb8] sm:$0xff] }
  0x13   :  { %141 = vmatpush3.msra.mxu0 %v40_v5  ;;  %v36_v14 = vld [vmem:[#allocation2 + $0x48] sm:$0xff]  ;;  %123 = vmatprep.mubr.f32.mxu0 %v26_v13  ;;  %v34_v18 = vld [vmem:[#allocation2 + $0x38] sm:$0xff]  ;;  %v49_v19 = vld [vmem:[#allocation2 + $0xb0] sm:$0xff] }
  0x14   :  { %142 = vmatprep.subr.mxu0 %v55_v6  ;;  %v33_v20 = vld [vmem:[#allocation2 + $0x30] sm:$0xff]  ;;  %v48_v21 = vld [vmem:[#allocation2 + $0xa8] sm:$0xff]  ;;  %v47_v23 = vld [vmem:[#allocation2 + $0xa0] sm:$0xff] }
  0x15   :  { %143 = vmatpush3.msra.mxu0 %v39_v7  ;;  %v32_v22 = vld [vmem:[#allocation2 + $0x28] sm:$0xff]  ;;  %v31_v24 = vld [vmem:[#allocation2 + $0x20] sm:$0xff]  ;;  %v46_v25 = vld [vmem:[#allocation2 + $0x98] sm:$0xff] }
  0x16   :  { %144 = vmatprep.subr.mxu0 %v54_v8  ;;  %v30_v26 = vld [vmem:[#allocation2 + $0x18] sm:$0xff]  ;;  %v45_v27 = vld [vmem:[#allocation2 + $0x90] sm:$0xff]  ;;  %v44_v29 = vld [vmem:[#allocation2 + $0x88] sm:$0xff] }
  0x17   :  { %145 = vmatpush3.msra.mxu0 %v38_v9  ;;  %v29_v28 = vld [vmem:[#allocation2 + $0x10] sm:$0xff]  ;;  %v28_v30 = vld [vmem:[#allocation2 + $0x8] sm:$0xff]  ;;  %v43_v31 = vld [vmem:[#allocation2 + $0x80] sm:$0xff] }
  0x18   :  { %146 = vmatprep.subr.mxu0 %v53_v10  ;;  %v27_v32 = vld [vmem:[#allocation2] sm:$0xff] }
  0x19   :  { %147 = vmatpush3.msra.mxu0 %v37_v11  ;;  %v25_v33 = vld [vmem:[%s226_s0] sm:$0xff] }
  0x1a   :  { %148 = vmatprep.subr.mxu0 %v52_v12 }
  0x1b   :  { %149 = vmatpush3.msra.mxu0 %v36_v14 }
  0x1c   :  { %150 = vmatprep.subr.mxu0 %v51_v15 }
  0x1d   :  { %151 = vmatpush3.msra.mxu0 %v35_v16 }
  0x1e   :  { %152 = vmatprep.subr.mxu0 %v50_v17 }
  0x1f   :  { %153 = vmatpush3.msra.mxu0 %v34_v18 }
  0x20   :  { %154 = vmatprep.subr.mxu0 %v49_v19 }
  0x21   :  { %155 = vmatpush3.msra.mxu0 %v33_v20 }
  0x22   :  { %156 = vmatprep.subr.mxu0 %v48_v21 }
  0x23   :  { %157 = vmatpush3.msra.mxu0 %v32_v22 }
  0x24   :  { %158 = vmatprep.subr.mxu0 %v47_v23 }
  0x25   :  { %159 = vmatpush3.msra.mxu0 %v31_v24 }
  0x26   :  { %160 = vmatprep.subr.mxu0 %v46_v25 }
  0x27   :  { %161 = vmatpush3.msra.mxu0 %v30_v26 }
  0x28   :  { %162 = vmatprep.subr.mxu0 %v45_v27 }
  0x29   :  { %163 = vmatpush3.msra.mxu0 %v29_v28 }
  0x2a   :  { %164 = vmatprep.subr.mxu0 %v44_v29 }
  0x2b   :  { %165 = vmatpush3.msra.mxu0 %v28_v30 }
  0x2c   :  { %166 = vmatprep.subr.mxu0 %v43_v31 }
  0x2d   :  { %167 = vmatpush3.msra.mxu0 %v27_v32 }
  0x2e   :  { %124 = vmatmul.mubr.f32.vlgmr.msra.gmra.mxu0 %v25_v33 }
  0xee   :  { %v168_v34 = vpop.f32.mrf.mxu0 }
  0xf0   :  { %v169_v35 = vpop.f32.mrf.mxu0 }
  0xf1   :  { %v170_v36 = vadd.f32 %v169_v35, %v168_v34 }
  0xf3   :  { %130 = vst.msk [vmem:[%s228_s2] sm:$0xff] %vm129_vm0, %v170_v36 }
  0xf4   :  { %135 = vsyncpa [#allocation3], 1 }

</bundles_post_ra>
